<compile_context>
chip_gen: v5e
topology: v5e:2x2
jax: 0.10.0
libtpu: 0.0.40
codegen_flags: <defaults>
</compile_context>

<pallas_src>
import functools

import jax
import jax.numpy as jnp
from jax import lax
from jax.experimental import pallas as pl
from jax.experimental.pallas import tpu as pltpu

_EPS = 1e-5                          # smoothing term in the Dice denominator
_MAX_TILE_VOXELS = 8192              # cap on the voxel tile (lane) width
_VMEM_TILE_BUDGET = 20 * 1024 * 1024  # bytes the per-tile working set may use
_VMEM_LIMIT_BYTES = 40 * 1024 * 1024  # scoped VMEM limit (fits v7x's 64 MiB physical)


def check_label_set_map(labels_superset_map, num_classes):
    """Light-weight equivalent of label_set_loss_functions.utils.check_label_set_map."""
    assert isinstance(labels_superset_map, dict) and len(labels_superset_map) > 0
    for s, leaves in labels_superset_map.items():
        assert int(s) >= num_classes, "superset labels must lie outside the leaf-class range"
        assert len(leaves) > 0
        for c in leaves:
            assert 0 <= int(c) < num_classes


def _round_up(x, m):
    return (x + m - 1) // m * m


def _pow(x, gamma):
    """x ** gamma; exact repeated-multiply for non-negative integer gamma."""
    if float(gamma).is_integer() and gamma >= 0:
        out = jnp.ones_like(x)
        for _ in range(int(gamma)):
            out = out * x
        return out
    return jnp.exp(gamma * jnp.log(jnp.maximum(x, 1e-30)))


def _leaf_dice_focal_kernel(logits_ref, target_ref, num_ref, den_ref, focal_ref, *,
                            N, C, V, tiles_per_core, padded, gamma, squared,
                            superset_items):
    """One voxel tile: softmax over classes, lane-dense Leaf-Dice / focal accumulation.

    logits_ref: (N*C, TV)   target_ref: (N, TV) i32
    num_ref/den_ref: (N*C, TV) f32 resident accumulators (one block per parallel core)
    focal_ref: (1, TV) f32 resident accumulator.
    """
    v = pl.program_id(1)             # tile index within this core ("arbitrary" axis)

    @pl.when(v == 0)
    def _init():
        num_ref[...] = jnp.zeros_like(num_ref)
        den_ref[...] = jnp.zeros_like(den_ref)
        focal_ref[...] = jnp.zeros_like(focal_ref)

    TV = logits_ref.shape[-1]

    # Hoisted, n-invariant per-tile values (JAX does not CSE broadcast_in_dim).
    class_ids = lax.broadcasted_iota(jnp.int32, (C, TV), 0)               # (C, TV)
    if padded:
        base = (pl.program_id(0) * tiles_per_core + v) * TV
        lane = lax.broadcasted_iota(jnp.int32, (1, TV), 1)
        vox_mask = ((lane + base) < V).astype(jnp.float32)                # (1, TV)

    focal_tile = jnp.zeros((1, TV), jnp.float32)

    for n in range(N):  # static unroll at trace time (N is small)
        xn = logits_ref[pl.ds(n * C, C), :].astype(jnp.float32)           # (C, TV)
        tn = target_ref[pl.ds(n, 1), :]                                   # (1, TV) int32

        # Numerically stable softmax over the class (sublane) axis.
        m = jnp.max(xn, axis=0, keepdims=True)                            # (1, TV)
        sh = xn - m
        ex = jnp.exp(sh)
        se = jnp.sum(ex, axis=0, keepdims=True)                           # (1, TV)
        inv_se = pl.reciprocal(se, approx=False)                          # EUP divide
        p = ex * inv_se                                                   # (C, TV)
        logse = jnp.log(se)                                               # (1, TV)

        # Leaf one-hot of the target: superset / padded / unknown labels -> all-zero column.
        g = (class_ids == tn).astype(jnp.float32)                         # (C, TV)

        # ---- Leaf-Dice element-wise partial sums (lane-dense, no per-tile reductions) ----
        pg = p * g
        den_n = (p * p if squared else p) + g                             # g**2 == g
        if padded:
            den_n = den_n * vox_mask   # padded voxels must not add probability mass
        num_ref[pl.ds(n * C, C), :] += pg
        den_ref[pl.ds(n * C, C), :] += den_n

        # ---- Marginalized focal loss, element-wise (lane reduction deferred to glue) ----
        pt = jnp.sum(pg, axis=0, keepdims=True)                           # (1, TV)
        logpt = jnp.sum(sh * g, axis=0, keepdims=True) - logse            # log-softmax at target
        valid = tn < C                                                    # leaf-labelled voxels
        for s_label, leaf_classes in superset_items:                      # static loop
            mask_s = tn == s_label                                        # (1, TV)
            p_s = p[leaf_classes[0]:leaf_classes[0] + 1, :]
            for c in leaf_classes[1:]:
                p_s = p_s + p[c:c + 1, :]                                 # marginalize over superset
            pt = jnp.where(mask_s, p_s, pt)
            logpt = jnp.where(mask_s, jnp.log(jnp.maximum(p_s, 1e-30)), logpt)
            valid = jnp.logical_or(valid, mask_s)

        one_minus = jnp.maximum(1.0 - pt, 0.0)
        focal_n = -_pow(one_minus, gamma) * logpt
        focal_tile = focal_tile + jnp.where(valid, focal_n, 0.0)          # others contribute 0

    focal_ref[...] += focal_tile


def _choose_tile(V, N, C, logits_itemsize, max_voxels_per_tile):
    """Largest multiple-of-128 voxel tile whose working set fits the VMEM budget."""
    nc_pad = _round_up(N * C, 8)
    n_pad = _round_up(N, 8)
    per_col = (2 * nc_pad * logits_itemsize   # double-buffered logits block
               + 2 * n_pad * 4                # double-buffered int32 target block
               + 2 * 2 * nc_pad * 4           # resident num/den accumulator blocks
               + 2 * 8 * 4)                   # resident focal accumulator block
    tv = (_VMEM_TILE_BUDGET // per_col) // 128 * 128
    tv = min(tv, _MAX_TILE_VOXELS, _round_up(V, 128))
    if max_voxels_per_tile is not None:
        tv = min(tv, max(128, max_voxels_per_tile // 128 * 128))
    return max(128, tv)


def leaf_dice_focal_loss(logits, target, labels_superset_map, *, gamma=2.0,
                         squared=True, reduction='mean', max_voxels_per_tile=None):
    """Forward pass of LeafDiceFocalLoss (weight=None). logits: (N,C,H,W), target: (N,H,W)."""
    N, C, H, W = logits.shape
    check_label_set_map(labels_superset_map, C)
    V = H * W

    x = logits.reshape(N * C, V)
    if x.dtype != jnp.bfloat16:   # stream bf16 untouched (halves HBM traffic), else use f32
        x = x.astype(jnp.float32)
    t = target.reshape(N, V).astype(jnp.int32)

    TV = _choose_tile(V, N, C, x.dtype.itemsize, max_voxels_per_tile)
    n_tiles = -(-V // TV)
    num_cores = 2 if n_tiles >= 2 else 1       # engage both v7x TensorCores when possible
    tiles_per_core = -(-n_tiles // num_cores)
    V_pad = num_cores * tiles_per_core * TV
    padded = V_pad != V

    if padded:
        # Pad with an "ignore" label (>= C, not a superset key): 0 Dice one-hot, 0 focal;
        # the in-kernel positional mask removes its probability mass from the Dice denominator.
        ignore_label = max(C, max(int(k) for k in labels_superset_map) + 1)
        x = jnp.pad(x, ((0, 0), (0, V_pad - V)))
        t = jnp.pad(t, ((0, 0), (0, V_pad - V)), constant_values=ignore_label)

    superset_items = tuple((int(k), tuple(int(c) for c in vv))
                           for k, vv in sorted(labels_superset_map.items()))

    kernel = functools.partial(
        _leaf_dice_focal_kernel, N=N, C=C, V=V, tiles_per_core=tiles_per_core,
        padded=padded, gamma=float(gamma), squared=bool(squared),
        superset_items=superset_items)

    num_out, den_out, focal_out = pl.pallas_call(
        kernel,
        out_shape=(
            jax.ShapeDtypeStruct((num_cores, N * C, TV), jnp.float32),  # Dice intersections
            jax.ShapeDtypeStruct((num_cores, N * C, TV), jnp.float32),  # Dice denominators
            jax.ShapeDtypeStruct((num_cores, 1, TV), jnp.float32),      # focal partial sums
        ),
        grid_spec=pltpu.PrefetchScalarGridSpec(
            num_scalar_prefetch=0,
            grid=(num_cores, tiles_per_core),
            in_specs=[
                pl.BlockSpec((N * C, TV), lambda p, v: (0, p * tiles_per_core + v)),
                pl.BlockSpec((N, TV), lambda p, v: (0, p * tiles_per_core + v)),
            ],
            out_specs=[
                pl.BlockSpec((None, N * C, TV), lambda p, v: (p, 0, 0)),
                pl.BlockSpec((None, N * C, TV), lambda p, v: (p, 0, 0)),
                pl.BlockSpec((None, 1, TV), lambda p, v: (p, 0, 0)),
            ],
        ),
        compiler_params=pltpu.CompilerParams(
            dimension_semantics=("parallel", "arbitrary"),
            vmem_limit_bytes=_VMEM_LIMIT_BYTES),
    )(x, t)

    # Tiny final reductions (glue).
    num = jnp.sum(num_out, axis=(0, 2)).reshape(N, C)
    den = jnp.sum(den_out, axis=(0, 2)).reshape(N, C)
    focal_sum = jnp.sum(focal_out)

    dice = 2.0 * num / (den + _EPS)                      # (N, C)
    dice_loss_per_sample = jnp.mean(1.0 - dice, axis=1)  # mean over classes -> (N,)
    if reduction == 'mean':
        return jnp.mean(dice_loss_per_sample) + focal_sum / float(N * V)
    elif reduction == 'sum':
        return jnp.sum(dice_loss_per_sample) + focal_sum
    else:
        # TODO(synk): reduction='none' returns per-sample Dice and per-voxel focal terms with
        # different shapes in the reference; only 'mean'/'sum' are supported here.
        raise NotImplementedError("reduction must be 'mean' or 'sum'")


def _reference_loss(logits, target, labels_superset_map, gamma, squared):
    """Pure-JAX reference of LeafDice + MarginalizedFocal (weight=None, reduction='mean')."""
    N, C, H, W = logits.shape
    x = logits.reshape(N, C, -1).astype(jnp.float32)
    t = target.reshape(N, -1)
    p = jax.nn.softmax(x, axis=1)
    logp = jax.nn.log_softmax(x, axis=1)
    g = (jnp.arange(C)[None, :, None] == t[:, None, :]).astype(jnp.float32)

    num = jnp.sum(p * g, axis=2)
    den = (jnp.sum(p * p, axis=2) if squared else jnp.sum(p, axis=2)) + jnp.sum(g, axis=2)
    dice_loss = jnp.mean(1.0 - 2.0 * num / (den + _EPS))

    pt = jnp.sum(p * g, axis=1)
    logpt = jnp.sum(logp * g, axis=1)
    valid = t < C
    for s, leaves in labels_superset_map.items():
        mask = t == s
        p_s = jnp.sum(p[:, jnp.asarray(list(leaves)), :], axis=1)
        pt = jnp.where(mask, p_s, pt)
        logpt = jnp.where(mask, jnp.log(p_s), logpt)
        valid = valid | mask
    focal = -_pow(jnp.maximum(1.0 - pt, 0.0), gamma) * logpt
    focal = jnp.where(valid, focal, 0.0)
    return dice_loss + jnp.mean(focal)


if __name__ == "__main__":
    key = jax.random.PRNGKey(0)
    labels_superset_map = {4: [1, 2], 5: [2, 3]}  # superset labels -> sets of leaf classes

    # Case 1: small volume, single tile, single parallel slice.
    N, C, H, W = 2, 4, 16, 16
    k1, k2 = jax.random.split(key)
    logits = jax.random.normal(k1, (N, C, H, W), dtype=jnp.float32)
    target = jax.random.randint(k2, (N, H, W), 0, C + len(labels_superset_map), dtype=jnp.int32)
    loss = leaf_dice_focal_loss(logits, target, labels_superset_map,
                                gamma=2.0, squared=True, reduction='mean')
    loss = jax.block_until_ready(loss)
    ref = _reference_loss(logits, target, labels_superset_map, gamma=2.0, squared=True)
    assert jnp.allclose(loss, ref, rtol=1e-4, atol=1e-5), (float(loss), float(ref))

    # Case 2: non-multiple-of-128 voxel count -> padding, multiple tiles, 2 parallel slices.
    H2, W2 = 24, 20
    k3, k4 = jax.random.split(k2)
    logits2 = jax.random.normal(k3, (N, C, H2, W2), dtype=jnp.float32)
    target2 = jax.random.randint(k4, (N, H2, W2), 0, C + len(labels_superset_map), dtype=jnp.int32)
    loss2 = leaf_dice_focal_loss(logits2, target2, labels_superset_map,
                                 gamma=2.0, squared=True, reduction='mean',
                                 max_voxels_per_tile=128)
    loss2 = jax.block_until_ready(loss2)
    ref2 = _reference_loss(logits2, target2, labels_superset_map, gamma=2.0, squared=True)
    assert jnp.allclose(loss2, ref2, rtol=1e-4, atol=1e-5), (float(loss2), float(ref2))

    print("KERNEL_OK")
</pallas_src>

<mosaic_0001>
module attributes {stable_mosaic.version = 11 : i64} {
  func.func @_leaf_dice_focal_kernel(%arg0: i32, %arg1: i32, %arg2: memref<8x256xf32, #tpu.memory_space<vmem>>, %arg3: memref<2x256xi32, #tpu.memory_space<vmem>>, %arg4: memref<1x8x256xf32, #tpu.memory_space<vmem>>, %arg5: memref<1x8x256xf32, #tpu.memory_space<vmem>>, %arg6: memref<1x1x256xf32, #tpu.memory_space<vmem>>) attributes {dimension_semantics = [#tpu.dimension_semantics<parallel>, #tpu.dimension_semantics<arbitrary>], iteration_bounds = array<i64: 1, 1>, scalar_prefetch = 0 : i64, scratch_operands = 0 : i64, tpu.core_type = #tpu.core_type<tc>, window_params = [{transform_indices = @transform_0, window_bounds = array<i64: 8, 256>}, {transform_indices = @transform_1, window_bounds = array<i64: 2, 256>}, {transform_indices = @transform_2, window_bounds = array<i64: 1, 8, 256>}, {transform_indices = @transform_3, window_bounds = array<i64: 1, 8, 256>}, {transform_indices = @transform_4, window_bounds = array<i64: 1, 1, 256>}]} {
    %c0_i32 = arith.constant 0 : i32
    %0 = arith.cmpi eq, %arg1, %c0_i32 : i32
    %1 = arith.extui %0 : i1 to i32
    %c0_i32_0 = arith.constant 0 : i32
    %2 = arith.cmpi ne, %1, %c0_i32_0 : i32
    scf.if %2 {
      %cst_62 = arith.constant 0.000000e+00 : f32
      %161 = vector.broadcast %cst_62 : f32 to vector<8x256xf32>
      %c0_63 = arith.constant 0 : index
      %c0_64 = arith.constant 0 : index
      %c0_65 = arith.constant 0 : index
      %162 = vector.load %arg4[%c0_63, %c0_64, %c0_65] : memref<1x8x256xf32, #tpu.memory_space<vmem>>, vector<1x8x256xf32>
      %163 = vector.shape_cast %162 : vector<1x8x256xf32> to vector<8x256xf32>
      %164 = vector.shape_cast %161 : vector<8x256xf32> to vector<1x8x256xf32>
      tpu.vector_store %arg4[%c0_63, %c0_64, %c0_65], %164 {strides = array<i32>} : memref<1x8x256xf32, #tpu.memory_space<vmem>>, vector<1x8x256xf32>,
      %cst_66 = arith.constant 0.000000e+00 : f32
      %165 = vector.broadcast %cst_66 : f32 to vector<8x256xf32>
      %c0_67 = arith.constant 0 : index
      %c0_68 = arith.constant 0 : index
      %c0_69 = arith.constant 0 : index
      %166 = vector.load %arg5[%c0_67, %c0_68, %c0_69] : memref<1x8x256xf32, #tpu.memory_space<vmem>>, vector<1x8x256xf32>
      %167 = vector.shape_cast %166 : vector<1x8x256xf32> to vector<8x256xf32>
      %168 = vector.shape_cast %165 : vector<8x256xf32> to vector<1x8x256xf32>
      tpu.vector_store %arg5[%c0_67, %c0_68, %c0_69], %168 {strides = array<i32>} : memref<1x8x256xf32, #tpu.memory_space<vmem>>, vector<1x8x256xf32>,
      %cst_70 = arith.constant 0.000000e+00 : f32
      %169 = vector.broadcast %cst_70 : f32 to vector<1x256xf32>
      %c0_71 = arith.constant 0 : index
      %c0_72 = arith.constant 0 : index
      %c0_73 = arith.constant 0 : index
      %170 = vector.load %arg6[%c0_71, %c0_72, %c0_73] : memref<1x1x256xf32, #tpu.memory_space<vmem>>, vector<1x1x256xf32>
      %171 = vector.shape_cast %170 : vector<1x1x256xf32> to vector<1x256xf32>
      %172 = vector.shape_cast %169 : vector<1x256xf32> to vector<1x1x256xf32>
      tpu.vector_store %arg6[%c0_71, %c0_72, %c0_73], %172 {strides = array<i32>} : memref<1x1x256xf32, #tpu.memory_space<vmem>>, vector<1x1x256xf32>,
    } else {
    }
    %3 = tpu.iota {dimensions = array<i32: 0>} : vector<4x256xi32>
    %cst = arith.constant 0.000000e+00 : f32
    %4 = vector.broadcast %cst : f32 to vector<1x256xf32>
    %c0 = arith.constant 0 : index
    %c0_1 = arith.constant 0 : index
    %5 = vector.load %arg2[%c0, %c0_1] : memref<8x256xf32, #tpu.memory_space<vmem>>, vector<4x256xf32>
    %c0_2 = arith.constant 0 : index
    %c0_3 = arith.constant 0 : index
    %6 = vector.load %arg3[%c0_2, %c0_3] : memref<2x256xi32, #tpu.memory_space<vmem>>, vector<1x256xi32>
    %cst_4 = arith.constant dense<0xFF800000> : vector<256xf32>
    %7 = vector.multi_reduction <maximumf>, %5, %cst_4 [0] : vector<4x256xf32> to vector<256xf32>
    %8 = vector.shape_cast %7 : vector<256xf32> to vector<1x256xf32>
    %9 = vector.broadcast %8 : vector<1x256xf32> to vector<4x256xf32>
    %10 = arith.subf %5, %9 : vector<4x256xf32>
    %11 = math.exp %10 : vector<4x256xf32>
    %cst_5 = arith.constant dense<0.000000e+00> : vector<256xf32>
    %12 = vector.multi_reduction <add>, %11, %cst_5 [0] : vector<4x256xf32> to vector<256xf32>
    %13 = vector.shape_cast %12 : vector<256xf32> to vector<1x256xf32>
    %14 = tpu.reciprocal %13 : vector<1x256xf32> -> vector<1x256xf32>
    %15 = vector.broadcast %14 : vector<1x256xf32> to vector<4x256xf32>
    %16 = arith.mulf %11, %15 : vector<4x256xf32>
    %17 = math.log %13 : vector<1x256xf32>
    %18 = vector.broadcast %6 : vector<1x256xi32> to vector<4x256xi32>
    %19 = arith.cmpi eq, %3, %18 : vector<4x256xi32>
    %20 = arith.extui %19 : vector<4x256xi1> to vector<4x256xi32>
    %21 = arith.sitofp %20 : vector<4x256xi32> to vector<4x256xf32>
    %22 = arith.mulf %16, %21 : vector<4x256xf32>
    %23 = arith.mulf %16, %16 : vector<4x256xf32>
    %24 = arith.addf %23, %21 : vector<4x256xf32>
    %c0_6 = arith.constant 0 : index
    %c0_7 = arith.constant 0 : index
    %c0_8 = arith.constant 0 : index
    %25 = vector.load %arg4[%c0_6, %c0_7, %c0_8] : memref<1x8x256xf32, #tpu.memory_space<vmem>>, vector<1x4x256xf32>
    %26 = vector.shape_cast %25 : vector<1x4x256xf32> to vector<4x256xf32>
    %27 = arith.addf %26, %22 : vector<4x256xf32>
    %c0_9 = arith.constant 0 : index
    %c0_10 = arith.constant 0 : index
    %c0_11 = arith.constant 0 : index
    %28 = vector.load %arg4[%c0_9, %c0_10, %c0_11] : memref<1x8x256xf32, #tpu.memory_space<vmem>>, vector<1x4x256xf32>
    %29 = vector.shape_cast %28 : vector<1x4x256xf32> to vector<4x256xf32>
    %30 = vector.shape_cast %27 : vector<4x256xf32> to vector<1x4x256xf32>
    tpu.vector_store %arg4[%c0_9, %c0_10, %c0_11], %30 {strides = array<i32>} : memref<1x8x256xf32, #tpu.memory_space<vmem>>, vector<1x4x256xf32>,
    %c0_12 = arith.constant 0 : index
    %c0_13 = arith.constant 0 : index
    %c0_14 = arith.constant 0 : index
    %31 = vector.load %arg5[%c0_12, %c0_13, %c0_14] : memref<1x8x256xf32, #tpu.memory_space<vmem>>, vector<1x4x256xf32>
    %32 = vector.shape_cast %31 : vector<1x4x256xf32> to vector<4x256xf32>
    %33 = arith.addf %32, %24 : vector<4x256xf32>
    %c0_15 = arith.constant 0 : index
    %c0_16 = arith.constant 0 : index
    %c0_17 = arith.constant 0 : index
    %34 = vector.load %arg5[%c0_15, %c0_16, %c0_17] : memref<1x8x256xf32, #tpu.memory_space<vmem>>, vector<1x4x256xf32>
    %35 = vector.shape_cast %34 : vector<1x4x256xf32> to vector<4x256xf32>
    %36 = vector.shape_cast %33 : vector<4x256xf32> to vector<1x4x256xf32>
    tpu.vector_store %arg5[%c0_15, %c0_16, %c0_17], %36 {strides = array<i32>} : memref<1x8x256xf32, #tpu.memory_space<vmem>>, vector<1x4x256xf32>,
    %cst_18 = arith.constant dense<0.000000e+00> : vector<256xf32>
    %37 = vector.multi_reduction <add>, %22, %cst_18 [0] : vector<4x256xf32> to vector<256xf32>
    %38 = vector.shape_cast %37 : vector<256xf32> to vector<1x256xf32>
    %39 = arith.mulf %10, %21 : vector<4x256xf32>
    %cst_19 = arith.constant dense<0.000000e+00> : vector<256xf32>
    %40 = vector.multi_reduction <add>, %39, %cst_19 [0] : vector<4x256xf32> to vector<256xf32>
    %41 = vector.shape_cast %40 : vector<256xf32> to vector<1x256xf32>
    %42 = arith.subf %41, %17 : vector<1x256xf32>
    %c4_i32 = arith.constant 4 : i32
    %43 = vector.broadcast %c4_i32 : i32 to vector<1x256xi32>
    %44 = arith.cmpi slt, %6, %43 : vector<1x256xi32>
    %c4_i32_20 = arith.constant 4 : i32
    %45 = vector.broadcast %c4_i32_20 : i32 to vector<1x256xi32>
    %46 = arith.cmpi eq, %6, %45 : vector<1x256xi32>
    %47 = vector.extract_strided_slice %16 {offsets = [1, 0], sizes = [1, 256], strides = [1, 1]} : vector<4x256xf32> to vector<1x256xf32>
    %48 = vector.extract_strided_slice %16 {offsets = [2, 0], sizes = [1, 256], strides = [1, 1]} : vector<4x256xf32> to vector<1x256xf32>
    %49 = arith.addf %47, %48 : vector<1x256xf32>
    %50 = arith.select %46, %49, %38 : vector<1x256xi1>, vector<1x256xf32>
    %cst_21 = arith.constant 1.000000e-30 : f32
    %51 = vector.broadcast %cst_21 : f32 to vector<1x256xf32>
    %52 = arith.maximumf %49, %51 : vector<1x256xf32>
    %53 = math.log %52 : vector<1x256xf32>
    %54 = arith.select %46, %53, %42 : vector<1x256xi1>, vector<1x256xf32>
    %55 = arith.ori %44, %46 : vector<1x256xi1>
    %c5_i32 = arith.constant 5 : i32
    %56 = vector.broadcast %c5_i32 : i32 to vector<1x256xi32>
    %57 = arith.cmpi eq, %6, %56 : vector<1x256xi32>
    %58 = vector.extract_strided_slice %16 {offsets = [2, 0], sizes = [1, 256], strides = [1, 1]} : vector<4x256xf32> to vector<1x256xf32>
    %59 = vector.extract_strided_slice %16 {offsets = [3, 0], sizes = [1, 256], strides = [1, 1]} : vector<4x256xf32> to vector<1x256xf32>
    %60 = arith.addf %58, %59 : vector<1x256xf32>
    %61 = arith.select %57, %60, %50 : vector<1x256xi1>, vector<1x256xf32>
    %cst_22 = arith.constant 1.000000e-30 : f32
    %62 = vector.broadcast %cst_22 : f32 to vector<1x256xf32>
    %63 = arith.maximumf %60, %62 : vector<1x256xf32>
    %64 = math.log %63 : vector<1x256xf32>
    %65 = arith.select %57, %64, %54 : vector<1x256xi1>, vector<1x256xf32>
    %66 = arith.ori %55, %57 : vector<1x256xi1>
    %cst_23 = arith.constant 1.000000e+00 : f32
    %67 = vector.broadcast %cst_23 : f32 to vector<1x256xf32>
    %68 = arith.subf %67, %61 : vector<1x256xf32>
    %cst_24 = arith.constant 0.000000e+00 : f32
    %69 = vector.broadcast %cst_24 : f32 to vector<1x256xf32>
    %70 = arith.maximumf %68, %69 : vector<1x256xf32>
    %cst_25 = arith.constant 1.000000e+00 : f32
    %71 = vector.broadcast %cst_25 : f32 to vector<1x256xf32>
    %72 = arith.mulf %71, %70 : vector<1x256xf32>
    %73 = arith.mulf %72, %70 : vector<1x256xf32>
    %cst_26 = arith.constant 0.000000e+00 : f32
    %74 = vector.broadcast %cst_26 : f32 to vector<1x256xf32>
    %75 = arith.subf %74, %73 : vector<1x256xf32>
    %76 = arith.mulf %75, %65 : vector<1x256xf32>
    %cst_27 = arith.constant 0.000000e+00 : f32
    %77 = vector.broadcast %cst_27 : f32 to vector<1x256xf32>
    %78 = arith.select %66, %76, %77 : vector<1x256xi1>, vector<1x256xf32>
    %79 = arith.addf %4, %78 : vector<1x256xf32>
    %c4 = arith.constant 4 : index
    %c0_28 = arith.constant 0 : index
    %80 = vector.load %arg2[%c4, %c0_28] : memref<8x256xf32, #tpu.memory_space<vmem>>, vector<4x256xf32>
    %c1 = arith.constant 1 : index
    %c0_29 = arith.constant 0 : index
    %81 = vector.load %arg3[%c1, %c0_29] : memref<2x256xi32, #tpu.memory_space<vmem>>, vector<1x256xi32>
    %cst_30 = arith.constant dense<0xFF800000> : vector<256xf32>
    %82 = vector.multi_reduction <maximumf>, %80, %cst_30 [0] : vector<4x256xf32> to vector<256xf32>
    %83 = vector.shape_cast %82 : vector<256xf32> to vector<1x256xf32>
    %84 = vector.broadcast %83 : vector<1x256xf32> to vector<4x256xf32>
    %85 = arith.subf %80, %84 : vector<4x256xf32>
    %86 = math.exp %85 : vector<4x256xf32>
    %cst_31 = arith.constant dense<0.000000e+00> : vector<256xf32>
    %87 = vector.multi_reduction <add>, %86, %cst_31 [0] : vector<4x256xf32> to vector<256xf32>
    %88 = vector.shape_cast %87 : vector<256xf32> to vector<1x256xf32>
    %89 = tpu.reciprocal %88 : vector<1x256xf32> -> vector<1x256xf32>
    %90 = vector.broadcast %89 : vector<1x256xf32> to vector<4x256xf32>
    %91 = arith.mulf %86, %90 : vector<4x256xf32>
    %92 = math.log %88 : vector<1x256xf32>
    %93 = vector.broadcast %81 : vector<1x256xi32> to vector<4x256xi32>
    %94 = arith.cmpi eq, %3, %93 : vector<4x256xi32>
    %95 = arith.extui %94 : vector<4x256xi1> to vector<4x256xi32>
    %96 = arith.sitofp %95 : vector<4x256xi32> to vector<4x256xf32>
    %97 = arith.mulf %91, %96 : vector<4x256xf32>
    %98 = arith.mulf %91, %91 : vector<4x256xf32>
    %99 = arith.addf %98, %96 : vector<4x256xf32>
    %c0_32 = arith.constant 0 : index
    %c4_33 = arith.constant 4 : index
    %c0_34 = arith.constant 0 : index
    %100 = vector.load %arg4[%c0_32, %c4_33, %c0_34] : memref<1x8x256xf32, #tpu.memory_space<vmem>>, vector<1x4x256xf32>
    %101 = vector.shape_cast %100 : vector<1x4x256xf32> to vector<4x256xf32>
    %102 = arith.addf %101, %97 : vector<4x256xf32>
    %c0_35 = arith.constant 0 : index
    %c4_36 = arith.constant 4 : index
    %c0_37 = arith.constant 0 : index
    %103 = vector.load %arg4[%c0_35, %c4_36, %c0_37] : memref<1x8x256xf32, #tpu.memory_space<vmem>>, vector<1x4x256xf32>
    %104 = vector.shape_cast %103 : vector<1x4x256xf32> to vector<4x256xf32>
    %105 = vector.shape_cast %102 : vector<4x256xf32> to vector<1x4x256xf32>
    tpu.vector_store %arg4[%c0_35, %c4_36, %c0_37], %105 {strides = array<i32>} : memref<1x8x256xf32, #tpu.memory_space<vmem>>, vector<1x4x256xf32>,
    %c0_38 = arith.constant 0 : index
    %c4_39 = arith.constant 4 : index
    %c0_40 = arith.constant 0 : index
    %106 = vector.load %arg5[%c0_38, %c4_39, %c0_40] : memref<1x8x256xf32, #tpu.memory_space<vmem>>, vector<1x4x256xf32>
    %107 = vector.shape_cast %106 : vector<1x4x256xf32> to vector<4x256xf32>
    %108 = arith.addf %107, %99 : vector<4x256xf32>
    %c0_41 = arith.constant 0 : index
    %c4_42 = arith.constant 4 : index
    %c0_43 = arith.constant 0 : index
    %109 = vector.load %arg5[%c0_41, %c4_42, %c0_43] : memref<1x8x256xf32, #tpu.memory_space<vmem>>, vector<1x4x256xf32>
    %110 = vector.shape_cast %109 : vector<1x4x256xf32> to vector<4x256xf32>
    %111 = vector.shape_cast %108 : vector<4x256xf32> to vector<1x4x256xf32>
    tpu.vector_store %arg5[%c0_41, %c4_42, %c0_43], %111 {strides = array<i32>} : memref<1x8x256xf32, #tpu.memory_space<vmem>>, vector<1x4x256xf32>,
    %cst_44 = arith.constant dense<0.000000e+00> : vector<256xf32>
    %112 = vector.multi_reduction <add>, %97, %cst_44 [0] : vector<4x256xf32> to vector<256xf32>
    %113 = vector.shape_cast %112 : vector<256xf32> to vector<1x256xf32>
    %114 = arith.mulf %85, %96 : vector<4x256xf32>
    %cst_45 = arith.constant dense<0.000000e+00> : vector<256xf32>
    %115 = vector.multi_reduction <add>, %114, %cst_45 [0] : vector<4x256xf32> to vector<256xf32>
    %116 = vector.shape_cast %115 : vector<256xf32> to vector<1x256xf32>
    %117 = arith.subf %116, %92 : vector<1x256xf32>
    %c4_i32_46 = arith.constant 4 : i32
    %118 = vector.broadcast %c4_i32_46 : i32 to vector<1x256xi32>
    %119 = arith.cmpi slt, %81, %118 : vector<1x256xi32>
    %c4_i32_47 = arith.constant 4 : i32
    %120 = vector.broadcast %c4_i32_47 : i32 to vector<1x256xi32>
    %121 = arith.cmpi eq, %81, %120 : vector<1x256xi32>
    %122 = vector.extract_strided_slice %91 {offsets = [1, 0], sizes = [1, 256], strides = [1, 1]} : vector<4x256xf32> to vector<1x256xf32>
    %123 = vector.extract_strided_slice %91 {offsets = [2, 0], sizes = [1, 256], strides = [1, 1]} : vector<4x256xf32> to vector<1x256xf32>
    %124 = arith.addf %122, %123 : vector<1x256xf32>
    %125 = arith.select %121, %124, %113 : vector<1x256xi1>, vector<1x256xf32>
    %cst_48 = arith.constant 1.000000e-30 : f32
    %126 = vector.broadcast %cst_48 : f32 to vector<1x256xf32>
    %127 = arith.maximumf %124, %126 : vector<1x256xf32>
    %128 = math.log %127 : vector<1x256xf32>
    %129 = arith.select %121, %128, %117 : vector<1x256xi1>, vector<1x256xf32>
    %130 = arith.ori %119, %121 : vector<1x256xi1>
    %c5_i32_49 = arith.constant 5 : i32
    %131 = vector.broadcast %c5_i32_49 : i32 to vector<1x256xi32>
    %132 = arith.cmpi eq, %81, %131 : vector<1x256xi32>
    %133 = vector.extract_strided_slice %91 {offsets = [2, 0], sizes = [1, 256], strides = [1, 1]} : vector<4x256xf32> to vector<1x256xf32>
    %134 = vector.extract_strided_slice %91 {offsets = [3, 0], sizes = [1, 256], strides = [1, 1]} : vector<4x256xf32> to vector<1x256xf32>
    %135 = arith.addf %133, %134 : vector<1x256xf32>
    %136 = arith.select %132, %135, %125 : vector<1x256xi1>, vector<1x256xf32>
    %cst_50 = arith.constant 1.000000e-30 : f32
    %137 = vector.broadcast %cst_50 : f32 to vector<1x256xf32>
    %138 = arith.maximumf %135, %137 : vector<1x256xf32>
    %139 = math.log %138 : vector<1x256xf32>
    %140 = arith.select %132, %139, %129 : vector<1x256xi1>, vector<1x256xf32>
    %141 = arith.ori %130, %132 : vector<1x256xi1>
    %cst_51 = arith.constant 1.000000e+00 : f32
    %142 = vector.broadcast %cst_51 : f32 to vector<1x256xf32>
    %143 = arith.subf %142, %136 : vector<1x256xf32>
    %cst_52 = arith.constant 0.000000e+00 : f32
    %144 = vector.broadcast %cst_52 : f32 to vector<1x256xf32>
    %145 = arith.maximumf %143, %144 : vector<1x256xf32>
    %cst_53 = arith.constant 1.000000e+00 : f32
    %146 = vector.broadcast %cst_53 : f32 to vector<1x256xf32>
    %147 = arith.mulf %146, %145 : vector<1x256xf32>
    %148 = arith.mulf %147, %145 : vector<1x256xf32>
    %cst_54 = arith.constant 0.000000e+00 : f32
    %149 = vector.broadcast %cst_54 : f32 to vector<1x256xf32>
    %150 = arith.subf %149, %148 : vector<1x256xf32>
    %151 = arith.mulf %150, %140 : vector<1x256xf32>
    %cst_55 = arith.constant 0.000000e+00 : f32
    %152 = vector.broadcast %cst_55 : f32 to vector<1x256xf32>
    %153 = arith.select %141, %151, %152 : vector<1x256xi1>, vector<1x256xf32>
    %154 = arith.addf %79, %153 : vector<1x256xf32>
    %c0_56 = arith.constant 0 : index
    %c0_57 = arith.constant 0 : index
    %c0_58 = arith.constant 0 : index
    %155 = vector.load %arg6[%c0_56, %c0_57, %c0_58] : memref<1x1x256xf32, #tpu.memory_space<vmem>>, vector<1x1x256xf32>
    %156 = vector.shape_cast %155 : vector<1x1x256xf32> to vector<1x256xf32>
    %157 = arith.addf %156, %154 : vector<1x256xf32>
    %c0_59 = arith.constant 0 : index
    %c0_60 = arith.constant 0 : index
    %c0_61 = arith.constant 0 : index
    %158 = vector.load %arg6[%c0_59, %c0_60, %c0_61] : memref<1x1x256xf32, #tpu.memory_space<vmem>>, vector<1x1x256xf32>
    %159 = vector.shape_cast %158 : vector<1x1x256xf32> to vector<1x256xf32>
    %160 = vector.shape_cast %157 : vector<1x256xf32> to vector<1x1x256xf32>
    tpu.vector_store %arg6[%c0_59, %c0_60, %c0_61], %160 {strides = array<i32>} : memref<1x1x256xf32, #tpu.memory_space<vmem>>, vector<1x1x256xf32>,
    return
  }
  func.func @transform_0(%arg0: i32, %arg1: i32) -> (i32, i32) {
    %c1_i32 = arith.constant 1 : i32
    %0 = arith.muli %arg0, %c1_i32 : i32
    %1 = arith.addi %0, %arg1 : i32
    %c0_i32 = arith.constant 0 : i32
    %c0_i32_0 = arith.constant 0 : i32
    return %c0_i32, %1 : i32, i32
  }
  func.func @transform_1(%arg0: i32, %arg1: i32) -> (i32, i32) {
    %c1_i32 = arith.constant 1 : i32
    %0 = arith.muli %arg0, %c1_i32 : i32
    %1 = arith.addi %0, %arg1 : i32
    %c0_i32 = arith.constant 0 : i32
    %c0_i32_0 = arith.constant 0 : i32
    return %c0_i32, %1 : i32, i32
  }
  func.func @transform_2(%arg0: i32, %arg1: i32) -> (i32, i32, i32) {
    %c0_i32 = arith.constant 0 : i32
    %c0_i32_0 = arith.constant 0 : i32
    %c0_i32_1 = arith.constant 0 : i32
    return %arg0, %c0_i32, %c0_i32_0 : i32, i32, i32
  }
  func.func @transform_3(%arg0: i32, %arg1: i32) -> (i32, i32, i32) {
    %c0_i32 = arith.constant 0 : i32
    %c0_i32_0 = arith.constant 0 : i32
    %c0_i32_1 = arith.constant 0 : i32
    return %arg0, %c0_i32, %c0_i32_0 : i32, i32, i32
  }
  func.func @transform_4(%arg0: i32, %arg1: i32) -> (i32, i32, i32) {
    %c0_i32 = arith.constant 0 : i32
    %c0_i32_0 = arith.constant 0 : i32
    %c0_i32_1 = arith.constant 0 : i32
    return %arg0, %c0_i32, %c0_i32_0 : i32, i32, i32
  }
}

</mosaic_0001>

<bundles_post_ra>
// kernel: tpu_custom_call.1
= control target key start
LH: loop header
LB: loop body
LE: loop exit
PB: predicated region body
PF: predicated region fallthrough
CT: control target
= control target key end

     0   :  { %10 = vsyncpa [#allocation3], 0  ;;  %s984_s0 = inlined_call_operand.hbm [shape: f32[8,256], index: 0, kind: input, shape index: {}]   ;;  %s985_s1 = inlined_call_operand.hbm [shape: s32[2,256], index: 1, kind: input, shape index: {}]   ;;  %s986_s2 = inlined_call_operand.hbm [shape: f32[1,8,256], index: 2, kind: output, shape index: {0}]   ;;  %s987_s3 = inlined_call_operand.hbm [shape: f32[1,8,256], index: 3, kind: output, shape index: {1}]   ;;  %s988_s4 = inlined_call_operand.hbm [shape: f32[1,1,256], index: 4, kind: output, shape index: {2}]  }
   0x1   :  { %11 = vsyncpa [#allocation6], 0 }
   0x2   :  { %12 = vsyncpa [#allocation4], 0 }
   0x3   :  { %13 = vsyncpa [#allocation9], 0  ;;  %s23_s17 = sshll.u32 %s984_s0, 4  ;;  %s711_s18 = smov [#allocation2]   ;;  %s24_s17 = int_to_ptr.hbm [resolvable:$true] %s23_s17 }
   0x4   :  { %s25_s19 = sshll.u32 %s711_s18, 4  ;;  %s38_s22 = sshll.u32 %s985_s1, 4  ;;  %s26_s19 = int_to_ptr.vmem [resolvable:$true] %s25_s19  ;;  %s39_s22 = int_to_ptr.hbm [resolvable:$true] %s38_s22 }
   0x5   :  { %28 = dma.hbm_to_vmem [thread:$0]  %s24_s17, 256, %s26_s19, [#allocation3]  }
   0x6   :  { %s712_s23 = smov [#allocation5]  }
   0x7   :  { %s40_s24 = sshll.u32 %s712_s23, 4  ;;  %s41_s24 = int_to_ptr.vmem [resolvable:$true] %s40_s24 }
   0x8   :  { %43 = dma.hbm_to_vmem [thread:$0]  %s39_s22, 64, %s41_s24, [#allocation6]  }
   0x9   :  { %703 = dma.done.wait [#allocation3], 256  }
   0xa   :  { %704 = vsyncadd [#allocation3], 4294967040 }
   0xb   :  { %705 = dma.done.wait [#allocation6], 64  }
   0xc   :  { %706 = vsyncadd [#allocation6], 4294967232  ;;  %vm74_vm0 = vcmask 1043456   ;;  %vm270_vm1 = vcmask 1047556   ;;  %v71_v0 = vld [vmem:[#allocation2] sm:$0xf]  ;;  %v64_v46 = vlaneseq }
   0xd   :  { %v72_v1 = vld [vmem:[#allocation2 + $0x8] sm:$0xf]  ;;  %v266_v2 = vld [vmem:[#allocation2] sm:$0xf0]  ;;  %v75_v3 = vsel %vm74_vm0, %v71_v0, -inf  ;;  %v713_v62 = vmov 0.0  }
   0xe   :  { %v82_v4 = vsel %vm74_vm0, %v72_v1, -inf  ;;  %v271_v5 = vsel %vm270_vm1, %v266_v2, -inf  ;;  %v267_v6 = vld [vmem:[#allocation2 + $0x8] sm:$0xf0]  ;;  %v76_v7 = vrot.slane %v75_v3, 4  ;;  %v773_v53 = vshrl.u32 %v64_v46, 7 }
   0xf   :  { %v83_v8 = vrot.slane %v82_v4, 4  ;;  %v272_v9 = vrot.slane %v271_v5, 4  ;;  %v278_v10 = vsel %vm270_vm1, %v267_v6, -inf  ;;  %v769_v50 = vld [vmem:[#allocation5] ss:$2 sm:$0x3] }
  0x10   :  { %v279_v11 = vrot.slane %v278_v10, 4  ;;  %v77_v12 = vmax.f32 %v75_v3, %v76_v7  ;;  %v144_v54 = vperm.slane %v769_v50, 1  ;;  %62 = vst [vmem:[#allocation8] sm:$0xff] %v713_v62  ;;  %v143_v63 = vperm.slane %v769_v50, 0  ;;  %s714_s0 = smov [#allocation8]   ;;  %s510_s27 = sshll.u32 %s987_s3, 4  ;;  %s511_s27 = int_to_ptr.hbm [resolvable:$true] %s510_s27 }
  0x11   :  { %v84_v13 = vmax.f32 %v82_v4, %v83_v8  ;;  %v273_v14 = vmax.f32 %v271_v5, %v272_v9  ;;  %60 = vst [vmem:[#allocation7] sm:$0xff] %v713_v62  ;;  %s921_s1 = sshll.u32 %s714_s0, 4  ;;  %s715_s3 = smov [#allocation7]   ;;  %s509_s1 = int_to_ptr.vmem [resolvable:$true] %s921_s1 }
  0x12   :  { %v280_v15 = vmax.f32 %v278_v10, %v279_v11  ;;  %v78_v16 = vrot.slane %v77_v12, 2  ;;  %vm146_vm2 = vcmp.eq.s32.totalorder %v773_v53, %v144_v54  ;;  %61 = vst [vmem:[#allocation7 + $0x8] sm:$0xff] %v713_v62  ;;  %vm145_vm3 = vcmp.eq.s32.totalorder %v773_v53, %v143_v63  ;;  %s497_s28 = sshll.u32 %s715_s3, 4  ;;  %s499_s5 = sshll.u32 %s986_s2, 4  ;;  %s498_s28 = int_to_ptr.vmem [resolvable:$true] %s497_s28  ;;  %s500_s5 = int_to_ptr.hbm [resolvable:$true] %s499_s5 }
  0x13   :  { %v85_v17 = vrot.slane %v84_v13, 2  ;;  %v274_v18 = vrot.slane %v273_v14, 2  ;;  %63 = vst [vmem:[#allocation8 + $0x8] sm:$0xff] %v713_v62  ;;  %s716_s2 = smov [#allocation10]   ;;  %s521_s9 = sshll.u32 %s988_s4, 4  ;;  %s522_s9 = int_to_ptr.hbm [resolvable:$true] %s521_s9 }
  0x14   :  { %v281_v19 = vrot.slane %v280_v15, 2  ;;  %v79_v20 = vmax.f32 %v77_v12, %v78_v16  ;;  %v790_v12 = vsel %vm145_vm3, 1.0, %v713_v62  ;;  %s519_s6 = sshll.u32 %s716_s2, 4  ;;  %s520_s6 = int_to_ptr.vmem [resolvable:$true] %s519_s6 }
  0x15   :  { %v86_v21 = vmax.f32 %v84_v13, %v85_v17  ;;  %v275_v22 = vmax.f32 %v273_v14, %v274_v18 }
  0x16   :  { %v282_v23 = vmax.f32 %v280_v15, %v281_v19  ;;  %v80_v24 = vrot.slane %v79_v20, 1 }
  0x17   :  { %v87_v25 = vrot.slane %v86_v21, 1  ;;  %v276_v26 = vrot.slane %v275_v22, 1 }
  0x18   :  { %v283_v27 = vrot.slane %v282_v23, 1  ;;  %v81_v28 = vmax.f32 %v79_v20, %v80_v24 }
  0x19   :  { %v88_v29 = vmax.f32 %v86_v21, %v87_v25  ;;  %v277_v30 = vmax.f32 %v275_v22, %v276_v26 }
  0x1a   :  { %v284_v31 = vmax.f32 %v282_v23, %v283_v27  ;;  %v89_v32 = vsub.f32 %v71_v0, %v81_v28 }
  0x1b   :  { %v90_v33 = vsub.f32 %v72_v1, %v88_v29  ;;  %v750_v34 = vsub.f32 %v266_v2, %v277_v30 }
  0x1c   :  { %v752_v35 = vsub.f32 %v267_v6, %v284_v31  ;;  %v91_v36 = vmul.f32 1.442695, %v89_v32  ;;  %v786_v6 = vsel %vm146_vm2, 1.0, %v713_v62  ;;  %v183_v15 = vmul.f32 %v790_v12, %v89_v32 }
  0x1d   :  { %v93_v37 = vmul.f32 1.442695, %v90_v33  ;;  %v287_v38 = vmul.f32 1.442695, %v750_v34  ;;  %v184_v9 = vmul.f32 %v786_v6, %v90_v33 }
  0x1e   :  { %v289_v39 = vmul.f32 1.442695, %v752_v35  ;;  %551 = vpow2.f32 %v91_v36  ;;  %v185_v19 = vsel %vm74_vm0, %v183_v15, 0.0 }
  0x1f   :  { %553 = vpow2.f32 %v93_v37  ;;  %v192_v16 = vsel %vm74_vm0, %v184_v9, 0.0  ;;  %v186_v20 = vrot.slane %v185_v19, 4 }
  0x20   :  { %555 = vpow2.f32 %v287_v38  ;;  %v193_v21 = vrot.slane %v192_v16, 4 }
  0x21   :  { %557 = vpow2.f32 %v289_v39  ;;  %v187_v26 = vadd.f32 %v186_v20, %v185_v19 }
  0x22   :  { %v194_v27 = vadd.f32 %v193_v21, %v192_v16 }
  0x23   :  { %v188_v37 = vrot.slane %v187_v26, 2 }
  0x24   :  { %v756_v40 = vpop.eup %551  ;;  %v195_v39 = vrot.slane %v194_v27, 2 }
  0x25   :  { %v758_v41 = vpop.eup %553  ;;  %v95_v42 = vsel %vm74_vm0, %v756_v40, 0.0  ;;  %v189_v54 = vadd.f32 %v188_v37, %v187_v26 }
  0x26   :  { %v762_v43 = vpop.eup %555  ;;  %v96_v44 = vrot.slane %v95_v42, 4  ;;  %v102_v45 = vsel %vm74_vm0, %v758_v41, 0.0 }
  0x27   :  { %v766_v47 = vpop.eup %557  ;;  %v103_v48 = vrot.slane %v102_v45, 4  ;;  %v293_v49 = vrot.slane %v762_v43, 4 }
  0x28   :  { %v97_v51 = vadd.f32 %v96_v44, %v95_v42  ;;  %v294_v52 = vrot.slane %v766_v47, 4 }
  0x29   :  { %v104_v55 = vadd.f32 %v103_v48, %v102_v45  ;;  %v297_v56 = vsel %vm74_vm0, %v293_v49, 0.0 }
  0x2a   :  { %v98_v57 = vrot.slane %v97_v51, 2  ;;  %v298_v58 = vrot.slane %v297_v56, 4  ;;  %v304_v59 = vsel %vm74_vm0, %v294_v52, 0.0 }
  0x2b   :  { %v105_v60 = vrot.slane %v104_v55, 2  ;;  %v305_v61 = vrot.slane %v304_v59, 4 }
  0x2c   :  { %v99_v0 = vadd.f32 %v98_v57, %v97_v51  ;;  %v299_v1 = vadd.f32 %v298_v58, %v297_v56  ;;  %v196_v57 = vadd.f32 %v195_v39, %v194_v27 }
  0x2d   :  { %v106_v2 = vadd.f32 %v105_v60, %v104_v55  ;;  %v306_v3 = vadd.f32 %v305_v61, %v304_v59 }
  0x2e   :  { %v100_v4 = vrot.slane %v99_v0, 1  ;;  %v300_v5 = vrot.slane %v299_v1, 2 }
  0x2f   :  { %v107_v7 = vrot.slane %v106_v2, 1  ;;  %v307_v8 = vrot.slane %v306_v3, 2 }
  0x30   :  { %v101_v10 = vadd.f32 %v100_v4, %v99_v0  ;;  %v301_v11 = vadd.f32 %v300_v5, %v299_v1 }
  0x31   :  { %v108_v13 = vadd.f32 %v107_v7, %v106_v2  ;;  %v308_v14 = vadd.f32 %v307_v8, %v306_v3  ;;  %v190_v3 = vrot.slane %v189_v54, 1  ;;  %v197_v8 = vrot.slane %v196_v57, 1 }
  0x32   :  { %559 = vrcp.f32 %v101_v10  ;;  %v302_v17 = vrot.slane %v301_v11, 1  ;;  %vm114_vm4 = vweird.f32 %v101_v10  ;;  %v118_v24 = vand.u32 2147483647, %v101_v10 }
  0x33   :  { %561 = vrcp.f32 %v108_v13  ;;  %v309_v18 = vrot.slane %v308_v14, 1  ;;  %v120_v30 = vand.u32 2147483648, %v101_v10  ;;  %vm128_vm5 = vweird.f32 %v108_v13 }
  0x34   :  { %v795_v22 = vadd.f32 %v302_v17, %v301_v11  ;;  %563 = vlog2.f32 %v108_v13  ;;  %v132_v32 = vand.u32 2147483647, %v108_v13  ;;  %v134_v33 = vand.u32 2147483648, %v108_v13 }
  0x35   :  { %v797_v25 = vadd.f32 %v309_v18, %v308_v14  ;;  %565 = vlog2.f32 %v101_v10  ;;  %v121_v45 = vor.u32 1.1754944e-38, %v120_v30  ;;  %vm119_vm9 = vcmp.eq.f32.partialorder %v118_v24, 8.507059e+37  ;;  %v831_v24 = vld [vmem:[#allocation5 + $0x1] ss:$2 sm:$0x3] }
  0x36   :  { %567 = vrcp.f32 %v795_v22  ;;  %v135_v52 = vor.u32 1.1754944e-38, %v134_v33  ;;  %vm133_vm11 = vcmp.eq.f32.partialorder %v132_v32, 8.507059e+37  ;;  %v191_v11 = vadd.f32 %v190_v3, %v189_v54 }
  0x37   :  { %569 = vrcp.f32 %v797_v25  ;;  %vm316_vm12 = vweird.f32 %v795_v22  ;;  %v322_v26 = vand.u32 2147483648, %v795_v22  ;;  %vm330_vm14 = vweird.f32 %v797_v25 }
  0x38   :  { %v560_v23 = vpop.eup %559  ;;  %v346_v37 = vperm.slane %v831_v24, 1 }
  0x39   :  { %v562_v28 = vpop.eup %561  ;;  %v110_v29 = vmul.f32 %v560_v23, %v101_v10  ;;  %vm115_vm6 = vweird.f32 %v560_v23 }
  0x3a   :  { %v124_v31 = vmul.f32 %v562_v28, %v108_v13  ;;  %vm129_vm7 = vweird.f32 %v562_v28  ;;  %vm802_vm8 = vmor %vm114_vm4, %vm115_vm6  ;;  %v564_v49 = vpop.eup %563  ;;  %v198_v13 = vadd.f32 %v197_v8, %v196_v57  ;;  %vm221_vm6 = vcmask 1040384  }
  0x3b   :  { %v111_v36 = vsub.f32 1.0, %v110_v29  ;;  %vm130_vm10 = vmor %vm128_vm5, %vm129_vm7  ;;  %v566_v55 = vpop.eup %565  ;;  %v142_v7 = vmul.f32 0.6931472, %v564_v49  ;;  %v336_v29 = vand.u32 2147483648, %v797_v25  ;;  %v345_v49 = vperm.slane %v831_v24, 0 }
  0x3c   :  { %v125_v38 = vsub.f32 1.0, %v124_v31  ;;  %v807_v58 = vpop.eup %567  ;;  %v140_v2 = vmul.f32 0.6931472, %v566_v55  ;;  %vm348_vm5 = vcmp.eq.s32.totalorder %v773_v53, %v346_v37 }
  0x3d   :  { %v112_v42 = vmul.f32 %v560_v23, %v111_v36  ;;  %v811_v60 = vpop.eup %569  ;;  %v312_v5 = vmul.f32 %v807_v58, %v795_v22  ;;  %v200_v17 = vsub.f32 %v198_v13, %v142_v7  ;;  %vm317_vm13 = vweird.f32 %v807_v58 }
  0x3e   :  { %v126_v48 = vmul.f32 %v562_v28, %v125_v38  ;;  %v326_v10 = vmul.f32 %v811_v60, %v797_v25  ;;  %v199_v15 = vsub.f32 %v191_v11, %v140_v2  ;;  %vm331_vm15 = vweird.f32 %v811_v60  ;;  %vm841_vm1 = vmor %vm316_vm12, %vm317_vm13 }
  0x3f   :  { %v113_v51 = vadd.f32 %v560_v23, %v112_v42  ;;  %v313_v16 = vsub.f32 1.0, %v312_v5  ;;  %v334_v36 = vand.u32 2147483647, %v797_v25  ;;  %vm848_vm2 = vmor %vm330_vm14, %vm331_vm15  ;;  %vm347_vm7 = vcmp.eq.s32.totalorder %v773_v53, %v345_v49 }
  0x40   :  { %v127_v56 = vadd.f32 %v562_v28, %v126_v48  ;;  %v327_v19 = vsub.f32 1.0, %v326_v10  ;;  %v240_v48 = vrot.slane %v200_v17, 7  ;;  %vm201_vm12 = vcmp.lt.s32.totalorder %v769_v50, 4 }
  0x41   :  { %v117_v59 = vsel %vm802_vm8, %v560_v23, %v113_v51  ;;  %v314_v21 = vmul.f32 %v807_v58, %v313_v16  ;;  %vm335_vm4 = vcmp.eq.f32.partialorder %v334_v36, 8.507059e+37  ;;  %vm905_vm8 = vcmp.lt.s32.totalorder %v64_v46, 256 }
  0x42   :  { %v122_v61 = vsel %vm119_vm9, %v121_v45, %v117_v59  ;;  %v131_v63 = vsel %vm130_vm10, %v562_v28, %v127_v56  ;;  %v328_v23 = vmul.f32 %v811_v60, %v327_v19  ;;  %v320_v28 = vand.u32 2147483647, %v795_v22  ;;  %68 = vst.msk [vmem:[#allocation10] sm:$0x3] %vm905_vm8, %v713_v62 }
  0x43   :  { %v814_v0 = vmul.f32 %v756_v40, %v122_v61  ;;  %v136_v1 = vsel %vm133_vm11, %v135_v52, %v131_v63  ;;  %v315_v27 = vadd.f32 %v807_v58, %v314_v21  ;;  %v323_v45 = vor.u32 1.1754944e-38, %v322_v26 }
  0x44   :  { %v817_v4 = vmul.f32 %v758_v41, %v136_v1  ;;  %v329_v33 = vadd.f32 %v811_v60, %v328_v23  ;;  %vm321_vm3 = vcmp.eq.f32.partialorder %v320_v28, 8.507059e+37  ;;  %v337_v52 = vor.u32 1.1754944e-38, %v336_v29 }
  0x45   :  { %v205_v9 = vrot.slane %v814_v0, 1  ;;  %v319_v51 = vsel %vm841_vm1, %v807_v58, %v315_v27  ;;  %v866_v57 = vsel %vm221_vm6, %v199_v15, %v240_v48  ;;  %v544_v59 = vsel %vm348_vm5, 1.0, %v713_v62 }
  0x46   :  { %v206_v40 = vrot.slane %v817_v4, 1  ;;  %v333_v54 = vsel %vm848_vm2, %v811_v60, %v329_v33  ;;  %v324_v55 = vsel %vm321_vm3, %v323_v45, %v319_v51  ;;  %v863_v56 = vmul.f32 %v786_v6, %v817_v4  ;;  %v371_v45 = vld [vmem:[#allocation8] sm:$0xf0] }
  0x47   :  { %v209_v14 = vadd.f32 %v205_v9, %v814_v0  ;;  %v338_v58 = vsel %vm335_vm4, %v337_v52, %v333_v54  ;;  %v339_v61 = vmul.f32 %v762_v43, %v324_v55  ;;  %v543_v60 = vsel %vm347_vm7, 1.0, %v713_v62  ;;  %v372_v52 = vld [vmem:[#allocation8 + $0x8] sm:$0xf0] }
  0x48   :  { %v210_v41 = vadd.f32 %v206_v40, %v817_v4  ;;  %v340_v63 = vmul.f32 %v766_v47, %v338_v58  ;;  %v356_v1 = vrot.slane %v544_v59, 4  ;;  %v874_v53 = vmul.f32 %v790_v12, %v814_v0 }
  0x49   :  { %213 = vst [vmem:[#allocation1] sm:$0xff] %v209_v14  ;;  %v225_v18 = vmax.f32 %v209_v14, 1e-30  ;;  %v176_v2 = vsel %vm74_vm0, %v863_v56, 0.0  ;;  %v425_v5 = vrot.slane %v339_v61, 1  ;;  %v355_v7 = vrot.slane %v543_v60, 4 }
  0x4a   :  { %214 = vst [vmem:[#allocation1 + $0x9] sm:$0xff] %v210_v41  ;;  %v226_v20 = vmax.f32 %v210_v41, 1e-30  ;;  %v177_v8 = vrot.slane %v176_v2, 4  ;;  %v169_v43 = vsel %vm74_vm0, %v874_v53, 0.0  ;;  %v882_v9 = vmul.f32 %v356_v1, %v340_v63 }
  0x4b   :  { %571 = vlog2.f32 %v225_v18  ;;  %v426_v47 = vrot.slane %v340_v63, 1  ;;  %v884_v10 = vadd.f32 %v425_v5, %v339_v61  ;;  %v398_v11 = vmul.f32 %v356_v1, %v752_v35  ;;  %v158_v5 = vld [vmem:[#allocation7 + $0x8] sm:$0xf] }
  0x4c   :  { %573 = vlog2.f32 %v226_v20  ;;  %v887_v40 = vmul.f32 %v355_v7, %v339_v61  ;;  %v397_v13 = vmul.f32 %v355_v7, %v750_v34  ;;  %v170_v15 = vrot.slane %v169_v43, 4 }
  0x4d   :  { %v380_v16 = vrot.slane %v882_v9, 4  ;;  %v444_v18 = vmax.f32 %v884_v10, 1e-30  ;;  %v402_v19 = vrot.slane %v398_v11, 4  ;;  %v153_v37 = vmul.f32 %v814_v0, %v814_v0 }
  0x4e   :  { %v379_v20 = vrot.slane %v887_v40, 4  ;;  %v401_v21 = vrot.slane %v397_v13, 4  ;;  %v171_v35 = vadd.f32 %v170_v15, %v169_v43  ;;  %v361_v42 = vmul.f32 %v339_v61, %v339_v61 }
  0x4f   :  { %v390_v34 = vsel %vm74_vm0, %v380_v16, 0.0  ;;  %575 = vlog2.f32 %v444_v18  ;;  %v412_v27 = vsel %vm74_vm0, %v402_v19, 0.0  ;;  %v362_v48 = vmul.f32 %v340_v63, %v340_v63  ;;  %v366_v19 = vld [vmem:[#allocation7 + $0x8] sm:$0xf0] }
  0x50   :  { %v383_v28 = vsel %vm74_vm0, %v379_v20, 0.0  ;;  %v902_v29 = vsel %vm74_vm0, %v401_v21, 0.0  ;;  %v391_v33 = vrot.slane %v390_v34, 4  ;;  %v155_v46 = vadd.f32 %v790_v12, %v153_v37 }
  0x51   :  { %v572_v30 = vpop.eup %571  ;;  %v839_v31 = vld [vmem:[#allocation1 + $0x1] ss:$9 sm:$0xff]  ;;  %v363_v51 = vadd.f32 %v361_v42, %v355_v7  ;;  %v413_v0 = vrot.slane %v412_v27, 4  ;;  %v364_v55 = vadd.f32 %v362_v48, %v356_v1  ;;  %v384_v59 = vrot.slane %v383_v28, 4 }
  0x52   :  { %v574_v38 = vpop.eup %573  ;;  %v228_v39 = vmul.f32 0.6931472, %v572_v30  ;;  %v172_v30 = vrot.slane %v171_v35, 2  ;;  %v392_v61 = vadd.f32 %v391_v33, %v390_v34  ;;  %v365_v1 = vld [vmem:[#allocation7] sm:$0xf0]  ;;  %v406_v43 = vrot.slane %v902_v29, 4 }
  0x53   :  { %v230_v44 = vmul.f32 0.6931472, %v574_v38  ;;  %v163_v38 = vld [vmem:[#allocation8] sm:$0xf]  ;;  %v385_v11 = vadd.f32 %v384_v59, %v383_v28  ;;  %v414_v15 = vadd.f32 %v413_v0, %v412_v27  ;;  %v367_v18 = vadd.f32 %v365_v1, %v887_v40 }
  0x54   :  { %233 = vst [vmem:[#allocation1] sm:$0xff] %v228_v39  ;;  %v173_v58 = vadd.f32 %v172_v30, %v171_v35  ;;  %v165_v62 = vadd.f32 %v163_v38, %v155_v46  ;;  %v393_v13 = vrot.slane %v392_v61, 2  ;;  %v368_v21 = vadd.f32 %v366_v19, %v882_v9 }
  0x55   :  { %234 = vst [vmem:[#allocation1 + $0x9] sm:$0xff] %v230_v44  ;;  %v576_v60 = vpop.eup %575  ;;  %v407_v40 = vadd.f32 %v406_v43, %v902_v29  ;;  %v415_v34 = vrot.slane %v414_v15, 2  ;;  %vm202_vm0 = vcmp.eq.s32.totalorder %v769_v50, 4  ;;  %vm245_vm9 = vcmp.eq.s32.totalorder %v769_v50, 5 }
  0x56   :  { %167 = vst [vmem:[#allocation8] sm:$0xf] %v165_v62  ;;  %v447_v20 = vmul.f32 0.6931472, %v576_v60  ;;  %v394_v35 = vadd.f32 %v393_v13, %v392_v61  ;;  %vm422_vm10 = vcmp.eq.s32.totalorder %v831_v24, 4  ;;  %vm464_vm11 = vcmp.eq.s32.totalorder %v831_v24, 5  ;;  %vm244_vm14 = vmor %vm201_vm12, %vm202_vm0 }
  0x57   :  { %369 = vst [vmem:[#allocation7] sm:$0xf0] %v367_v18  ;;  %v416_v33 = vadd.f32 %v415_v34, %v414_v15  ;;  %vm421_vm13 = vcmp.lt.s32.totalorder %v831_v24, 4  ;;  %vm258_vm1 = vmor %vm244_vm14, %vm245_vm9  ;;  %v485_v15 = vld [vmem:[#allocation10] sm:$0x3] }
  0x58   :  { %370 = vst [vmem:[#allocation7 + $0x8] sm:$0xf0] %v368_v21  ;;  %v395_v30 = vrot.slane %v394_v35, 1  ;;  %vm463_vm15 = vmor %vm421_vm13, %vm422_vm10 }
  0x59   :  { %v417_v42 = vrot.slane %v416_v33, 1  ;;  %vm477_vm2 = vmor %vm463_vm15, %vm464_vm11 }
  0x5a   :  { %v396_v37 = vadd.f32 %v395_v30, %v394_v35 }
  0x5c   :  { %v878_v3 = vld [vmem:[#allocation1 + $0x1] ss:$9 sm:$0xff]  ;;  %v440_v46 = vrot.slane %v396_v37, 7 }
  0x5d   :  { %246 = vst [vmem:[#allocation1] sm:$0xff] %v209_v14  ;;  %v178_v14 = vadd.f32 %v177_v8, %v176_v2 }
  0x5e   :  { %247 = vst [vmem:[#allocation1 + $0x9] sm:$0xff] %v210_v41  ;;  %v891_v41 = vadd.f32 %v426_v47, %v340_v63  ;;  %v373_v63 = vadd.f32 %v371_v45, %v363_v51  ;;  %v160_v47 = vadd.f32 %v158_v5, %v863_v56  ;;  %v243_v5 = vsel %vm202_vm0, %v878_v3, %v866_v57 }
  0x5f   :  { %v179_v23 = vrot.slane %v178_v14, 2 }
  0x60   :  { %v445_v26 = vmax.f32 %v891_v41, 1e-30  ;;  %375 = vst [vmem:[#allocation8] sm:$0xf0] %v373_v63 }
  0x61   :  { %v180_v32 = vadd.f32 %v179_v23, %v178_v14  ;;  %v174_v14 = vrot.slane %v173_v58, 1  ;;  %162 = vst [vmem:[#allocation7 + $0x8] sm:$0xf] %v160_v47 }
  0x62   :  { %577 = vlog2.f32 %v445_v26 }
  0x63   :  { %v181_v12 = vrot.slane %v180_v32, 1  ;;  %v175_v26 = vadd.f32 %v174_v14, %v173_v58  ;;  %579 = vlog2.f32 %v797_v25 }
  0x64   :  { %581 = vlog2.f32 %v795_v22 }
  0x65   :  { %v893_v17 = vld [vmem:[#allocation1 + $0x2] ss:$9 sm:$0xff]  ;;  %v182_v16 = vadd.f32 %v181_v12, %v180_v32  ;;  %v408_v32 = vrot.slane %v407_v40, 2 }
  0x66   :  { %252 = vst [vmem:[#allocation1] sm:$0xff] %v228_v39  ;;  %v154_v39 = vmul.f32 %v817_v4, %v817_v4  ;;  %v157_v4 = vld [vmem:[#allocation7] sm:$0xf] }
  0x67   :  { %253 = vst [vmem:[#allocation1 + $0x9] sm:$0xff] %v230_v44  ;;  %v164_v44 = vld [vmem:[#allocation8 + $0x8] sm:$0xf]  ;;  %v159_v7 = vadd.f32 %v157_v4, %v874_v53  ;;  %v386_v53 = vrot.slane %v385_v11, 2  ;;  %v220_v27 = vrot.slane %v182_v16, 7 }
  0x68   :  { %v156_v49 = vadd.f32 %v786_v6, %v154_v39  ;;  %v374_v6 = vadd.f32 %v372_v52, %v364_v55  ;;  %v578_v8 = vpop.eup %577  ;;  %v409_v39 = vadd.f32 %v408_v32, %v407_v40  ;;  %v418_v52 = vadd.f32 %v417_v42, %v416_v33 }
  0x69   :  { %v449_v56 = vmul.f32 0.6931472, %v578_v8  ;;  %161 = vst [vmem:[#allocation7] sm:$0xf] %v159_v7  ;;  %v387_v28 = vadd.f32 %v386_v53, %v385_v11  ;;  %v222_v9 = vsel %vm221_vm6, %v175_v26, %v220_v27 }
  0x6a   :  { %v166_v2 = vadd.f32 %v164_v44, %v156_v49  ;;  %376 = vst [vmem:[#allocation8 + $0x8] sm:$0xf0] %v374_v6  ;;  %502 = dma.vmem_to_hbm [thread:$0]  %s498_s28, 256, %s500_s5, [#allocation4]   ;;  %v224_v38 = vsel %vm202_vm0, %v839_v31, %v222_v9  ;;  %v580_v44 = vpop.eup %579  ;;  %v410_v51 = vrot.slane %v409_v39, 1 }
  0x6b   :  { %v388_v29 = vrot.slane %v387_v28, 1  ;;  %v251_v25 = vsel %vm245_vm9, %v893_v17, %v224_v38  ;;  %v344_v31 = vmul.f32 0.6931472, %v580_v44  ;;  %v582_v0 = vpop.eup %581 }
  0x6c   :  { %168 = vst [vmem:[#allocation8 + $0x8] sm:$0xf] %v166_v2  ;;  %v259_v49 = vsub.f32 1.0, %v251_v25  ;;  %v411_v4 = vadd.f32 %v410_v51, %v409_v39  ;;  %v342_v17 = vmul.f32 0.6931472, %v582_v0 }
  0x6d   :  { %513 = dma.vmem_to_hbm [thread:$0]  %s509_s1, 256, %s511_s27, [#allocation9]   ;;  %v389_v48 = vadd.f32 %v388_v29, %v387_v28  ;;  %v420_v58 = vsub.f32 %v418_v52, %v344_v31 }
  0x6e   :  { %v918_v54 = vld [vmem:[#allocation1 + $0x2] ss:$9 sm:$0xff]  ;;  %v260_v22 = vmax.f32 %v259_v49, 0.0  ;;  %v419_v60 = vsub.f32 %v411_v4, %v342_v17 }
  0x6f   :  { %433 = vst [vmem:[#allocation1] sm:$0xff] %v884_v10  ;;  %v441_v55 = vsel %vm221_vm6, %v389_v48, %v440_v46  ;;  %v459_v62 = vrot.slane %v420_v58, 7  ;;  %v257_v6 = vsel %vm245_vm9, %v918_v54, %v243_v5 }
  0x70   :  { %434 = vst [vmem:[#allocation1 + $0x9] sm:$0xff] %v891_v41  ;;  %v261_v59 = vmul.f32 %v260_v22, %v260_v22 }
  0x71   :  { %v460_v1 = vsel %vm221_vm6, %v419_v60, %v459_v62 }
  0x72   :  { %v262_v12 = vsub.f32 0.0, %v261_v59 }
  0x74   :  { %v263_v43 = vmul.f32 %v262_v12, %v257_v6 }
  0x76   :  { %v264_v11 = vsel %vm258_vm1, %v263_v43, 0.0 }
  0x77   :  { %v436_v23 = vld [vmem:[#allocation1 + $0x5] ss:$9 sm:$0xff] }
  0x78   :  { %452 = vst [vmem:[#allocation1] sm:$0xff] %v447_v20 }
  0x79   :  { %453 = vst [vmem:[#allocation1 + $0x9] sm:$0xff] %v449_v56 }
  0x80   :  { %v455_v45 = vld [vmem:[#allocation1 + $0x5] ss:$9 sm:$0xff] }
  0x81   :  { %465 = vst [vmem:[#allocation1] sm:$0xff] %v884_v10  ;;  %v462_v57 = vsel %vm422_vm10, %v455_v45, %v460_v1 }
  0x82   :  { %466 = vst [vmem:[#allocation1 + $0x9] sm:$0xff] %v891_v41  ;;  %v443_v41 = vsel %vm422_vm10, %v436_v23, %v441_v55 }
  0x89   :  { %v468_v10 = vld [vmem:[#allocation1 + $0x6] ss:$9 sm:$0xff] }
  0x8a   :  { %471 = vst [vmem:[#allocation1] sm:$0xff] %v447_v20  ;;  %v470_v61 = vsel %vm464_vm11, %v468_v10, %v443_v41 }
  0x8b   :  { %472 = vst [vmem:[#allocation1 + $0x9] sm:$0xff] %v449_v56  ;;  %v478_v2 = vsub.f32 1.0, %v470_v61 }
  0x8d   :  { %v479_v63 = vmax.f32 %v478_v2, 0.0 }
  0x8f   :  { %v480_v7 = vmul.f32 %v479_v63, %v479_v63 }
  0x91   :  { %v481_v8 = vsub.f32 0.0, %v480_v7 }
  0x92   :  { %v474_v3 = vld [vmem:[#allocation1 + $0x6] ss:$9 sm:$0xff] }
  0x93   :  { %v476_v47 = vsel %vm464_vm11, %v474_v3, %v462_v57 }
  0x94   :  { %v482_v54 = vmul.f32 %v481_v8, %v476_v47 }
  0x96   :  { %v483_v13 = vsel %vm477_vm2, %v482_v54, 0.0 }
  0x97   :  { %v484_v50 = vadd.f32 %v483_v13, %v264_v11 }
  0x99   :  { %v486_v14 = vadd.f32 %v485_v15, %v484_v50 }
  0x9b   :  { %491 = vst.msk [vmem:[#allocation10] sm:$0x3] %vm905_vm8, %v486_v14 }
  0x9c   :  { %524 = dma.vmem_to_hbm [thread:$0]  %s520_s6, 32, %s522_s9, [#allocation9]  }
  0x9d   :  { %707 = dma.done.wait [#allocation4], 256  }
  0x9e   :  { %708 = vsyncadd [#allocation4], 4294967040 }
  0x9f   :  { %709 = dma.done.wait [#allocation9], 288  }
  0xa0   :  { %710 = vsyncadd [#allocation9], 4294967008 }
  0xa1   :  { %537 = vsyncpa [#allocation3], 1 }
  0xa2   :  { %538 = vsyncpa [#allocation6], 1 }
  0xa3   :  { %539 = vsyncpa [#allocation4], 1 }
  0xa4   :  { %540 = vsyncpa [#allocation9], 1 }

</bundles_post_ra>
